<compile_context>
chip_gen: v7x
topology: tpu7x:2x2x1
jax: 0.10.0
libtpu: 0.0.40
codegen_flags: <defaults>
</compile_context>

<pallas_src>
import functools

import jax
import jax.numpy as jnp
from jax.experimental import pallas as pl
from jax.experimental.pallas import tpu as pltpu


def _soft_target_kernel(s_ref, t_ref, o_ref, acc_ref, *, temperature, batch_size,
                        exp_dtype, use_mxu_reduce):
    """KL contribution of one (batch_tile, C) strip, accumulated across the inner axis."""
    i = pl.program_id(1)

    @pl.when(i == 0)
    def _init():
        acc_ref[...] = jnp.zeros_like(acc_ref)

    inv_t = 1.0 / temperature
    s = s_ref[...].astype(jnp.float32) * inv_t  # student logits / T
    t = t_ref[...].astype(jnp.float32) * inv_t  # teacher logits / T

    # Numerically-stable per-row max shifts.
    s_shift = s - jnp.max(s, axis=-1, keepdims=True)
    t_shift = t - jnp.max(t, axis=-1, keepdims=True)

    # EUP: exponentials in bf16 on v6e/v7x (halves transcendental work),
    # f32 elsewhere; sums always accumulate in f32.
    s_exp = jnp.exp(s_shift.astype(exp_dtype)).astype(jnp.float32)
    t_exp = jnp.exp(t_shift.astype(exp_dtype)).astype(jnp.float32)

    C = s_ref.shape[-1]
    if use_mxu_reduce:
        # Offload the lane-axis sums to the idle MXU: a (C,128) ones matmul makes
        # every result column equal the row sum; take lane 0. f32 passes keep
        # t_sum precise; the ones constant is a cheap splat.
        ones = jnp.ones((C, 128), jnp.float32)

        def lane_sum(x):
            return jnp.dot(x, ones, preferred_element_type=jnp.float32)[:, :1]
    else:
        def lane_sum(x):
            return jnp.sum(x, axis=-1, keepdims=True)

    s_sum = lane_sum(s_exp)                                  # (tile, 1)
    t_sum = lane_sum(t_exp)                                  # (tile, 1)
    # Per-row KL using sum_c p_t == 1 (no explicit p_t / log_p_t / log_p_s tensors):
    #   KL = (sum_c t_exp * (t_shift - s_shift)) / t_sum + log(s_sum / t_sum)
    cross = lane_sum(t_exp * (t_shift - s_shift))            # (tile, 1)

    row_kl = cross / t_sum + jnp.log(s_sum / t_sum)          # (tile, 1)

    # Fold this step's contribution to a scalar partial (tiny accumulator, no
    # masked lane-1 store stream).
    acc_ref[...] += jnp.sum(row_kl, axis=0, keepdims=True)   # (1, 1)

    @pl.when(i == pl.num_programs(1) - 1)
    def _finalize():
        scale = temperature * temperature / batch_size       # batchmean * T^2
        total = acc_ref[...] * scale                         # (1, 1)
        # Broadcast the scaled partial across this partition's lane-dense slab.
        o_ref[...] = jnp.broadcast_to(total.reshape(1, 1, 1), o_ref.shape)


def _vmem_capacity_bytes():
    try:
        return int(pltpu.get_tpu_info().vmem_capacity_bytes)
    except Exception:
        return 64 * 1024 * 1024  # conservative (v7x-sized) fallback


def _is_v6_or_newer():
    """bf16 EUP + compute-bound regime only exist on v6e / v7x."""
    try:
        kind = jax.devices()[0].device_kind.lower()
    except Exception:
        return False
    return ("v6" in kind) or ("v7" in kind) or ("7x" in kind)


def _pick_batch_tile(rows, C, itemsize, vmem_bytes, sub):
    """Largest batch tile (multiple of the sublane pack, dividing `rows`) whose
    working set -- 2 inputs x 2 pipeline buffers PLUS ~6 full-tile f32
    temporaries (s, t, shifts, exps, product) and the MXU lane-reduce outputs --
    fits the per-generation VMEM budget."""
    # v5e/v6e (128 MiB): ~1/2 of VMEM (fewer, larger DMA steps for the HBM-bound
    # regime); v7x (64 MiB): ~3/8 to leave pipeline headroom.
    budget = vmem_bytes // 2 if vmem_bytes >= (96 << 20) else (vmem_bytes * 3) // 8
    bytes_per_row = 4 * C * itemsize + 6 * C * 4 + 3 * 128 * 4 + 1024
    max_rows = max(sub, (budget // bytes_per_row) // sub * sub)
    tile = max(sub, min(rows, max_rows))
    tile = (tile // sub) * sub
    while rows % tile != 0:   # rows is a multiple of sub, so this terminates at sub
        tile -= sub
    return tile


def soft_target_loss(out_s, out_t, temperature=4.0, batch_tile=None,
                     exp_dtype=None, use_mxu_reduce=None):
    """SoftTarget distillation loss computed in a Pallas TPU kernel."""
    assert out_s.shape == out_t.shape and out_s.ndim == 2
    B, C = out_s.shape
    itemsize = jnp.dtype(out_s.dtype).itemsize
    sub = 16 if itemsize == 2 else (32 if itemsize == 1 else 8)

    new_gen = _is_v6_or_newer()
    if exp_dtype is None:
        exp_dtype = jnp.bfloat16 if new_gen else jnp.float32
    if use_mxu_reduce is None:
        use_mxu_reduce = new_gen

    # Two partitions so the leading "parallel" axis can shard across v7x's two
    # TensorCores; pad the batch so the split is exactly even (pad rows are
    # identical zeros in both tensors and contribute exactly 0 KL).
    num_parts = 2 if B > sub else 1
    pack = sub * num_parts
    B_pad = ((B + pack - 1) // pack) * pack
    if B_pad != B:
        pad = ((0, B_pad - B), (0, 0))
        out_s = jnp.pad(out_s, pad)
        out_t = jnp.pad(out_t, pad)

    vmem_bytes = _vmem_capacity_bytes()
    rows_per_part = B_pad // num_parts
    if batch_tile is None:
        batch_tile = _pick_batch_tile(rows_per_part, C, itemsize, vmem_bytes, sub)
    assert rows_per_part % batch_tile == 0, "batch tile must divide per-partition rows"
    n_inner = rows_per_part // batch_tile

    kernel = functools.partial(
        _soft_target_kernel,
        temperature=float(temperature),
        batch_size=float(B),          # true batch size; pad rows contribute 0
        exp_dtype=exp_dtype,
        use_mxu_reduce=use_mxu_reduce,
    )

    # Scoped VMEM limit: fixed fraction of physical VMEM (96 MiB on v5e/v6e,
    # 48 MiB on v7x) -- decoupled from the tile estimate so the compiler always
    # has headroom for its f32 temporaries; the tile picker provides the margin.
    vmem_limit = int(vmem_bytes * 3 // 4)

    mxu_flops_per_row = (3 * 2 * 128 * C) if use_mxu_reduce else 0
    cost = pl.CostEstimate(
        flops=B_pad * (12 * C + mxu_flops_per_row),
        transcendentals=2 * B_pad * C + 2 * B_pad,
        bytes_accessed=2 * B_pad * C * itemsize + num_parts * 8 * 128 * 4,
    )

    out = pl.pallas_call(
        kernel,
        out_shape=jax.ShapeDtypeStruct((num_parts, 8, 128), jnp.float32),
        grid_spec=pltpu.PrefetchScalarGridSpec(
            num_scalar_prefetch=0,
            grid=(num_parts, n_inner),
            in_specs=[
                pl.BlockSpec((batch_tile, C), lambda p, i: (p * n_inner + i, 0)),
                pl.BlockSpec((batch_tile, C), lambda p, i: (p * n_inner + i, 0)),
            ],
            out_specs=pl.BlockSpec((1, 8, 128), lambda p, i: (p, 0, 0)),
            scratch_shapes=[pltpu.VMEM((1, 1), jnp.float32)],
        ),
        compiler_params=pltpu.CompilerParams(
            dimension_semantics=("parallel", "arbitrary"),
            vmem_limit_bytes=vmem_limit,
        ),
        cost_estimate=cost,
    )(out_s, out_t)

    # Each partition wrote its scaled partial (broadcast across its slab).
    return jnp.sum(out[:, 0, 0])


def _reference_loss(out_s, out_t, temperature=4.0):
    """Pure-JAX reference matching F.kl_div(log_softmax, softmax, 'batchmean')*T*T."""
    s = out_s.astype(jnp.float32) / temperature
    t = out_t.astype(jnp.float32) / temperature
    log_p_s = jax.nn.log_softmax(s, axis=1)
    p_t = jax.nn.softmax(t, axis=1)
    log_p_t = jax.nn.log_softmax(t, axis=1)
    kl = jnp.sum(p_t * (log_p_t - log_p_s))
    return kl / out_s.shape[0] * temperature * temperature


if __name__ == "__main__":
    key = jax.random.PRNGKey(0)
    k_s, k_t = jax.random.split(key)

    B, C = 8, 128  # small logits: batch=8, num_classes=128 (lane-dense last dim)
    out_s = jax.random.normal(k_s, (B, C), dtype=jnp.float32)
    out_t = jax.random.normal(k_t, (B, C), dtype=jnp.float32)
    ref = _reference_loss(out_s, out_t, temperature=4.0)

    # 1) Conservative path (f32 exps, VALU/XLU reductions): strict check of the
    #    algebraic KL simplification + accumulator logic.
    loss_exact = jax.block_until_ready(
        soft_target_loss(out_s, out_t, temperature=4.0,
                         exp_dtype=jnp.float32, use_mxu_reduce=False))
    assert jnp.allclose(loss_exact, ref, rtol=1e-4, atol=1e-6), (loss_exact, ref)

    # 2) Default perf path (bf16 EUP exps + MXU lane-reduce on v6e/v7x; identical
    #    to (1) on v5e): bf16 rounding bounds the error, so use a looser check.
    loss_fast = jax.block_until_ready(soft_target_loss(out_s, out_t, temperature=4.0))
    assert jnp.allclose(loss_fast, ref, rtol=1e-2, atol=1e-4), (loss_fast, ref)

    # 3) Multi-tile / two-partition accumulation across the inner grid axis,
    #    validated strictly on the conservative path.
    B2 = 64
    k_s2, k_t2 = jax.random.split(jax.random.PRNGKey(1))
    s2 = jax.random.normal(k_s2, (B2, C), dtype=jnp.float32)
    t2 = jax.random.normal(k_t2, (B2, C), dtype=jnp.float32)
    ref2 = _reference_loss(s2, t2, temperature=4.0)
    loss2 = jax.block_until_ready(
        soft_target_loss(s2, t2, temperature=4.0, batch_tile=8,
                         exp_dtype=jnp.float32, use_mxu_reduce=False))
    assert jnp.allclose(loss2, ref2, rtol=1e-4, atol=1e-6), (loss2, ref2)

    # 4) bf16 logits (half the HBM traffic) with a ragged batch exercising the
    #    zero-pad path; default perf config, loose tolerance.
    B3 = 10
    s3 = jax.random.normal(k_s, (B3, C), dtype=jnp.bfloat16)
    t3 = jax.random.normal(k_t, (B3, C), dtype=jnp.bfloat16)
    ref3 = _reference_loss(s3, t3, temperature=4.0)
    loss3 = jax.block_until_ready(soft_target_loss(s3, t3, temperature=4.0))
    assert jnp.allclose(loss3, ref3, rtol=1e-2, atol=1e-4), (loss3, ref3)

    print("KERNEL_OK")
</pallas_src>

<mosaic_0001>
module attributes {stable_mosaic.version = 11 : i64} {
  func.func @_soft_target_kernel(%arg0: i32, %arg1: i32, %arg2: memref<8x128xf32, #tpu.memory_space<vmem>>, %arg3: memref<8x128xf32, #tpu.memory_space<vmem>>, %arg4: memref<1x8x128xf32, #tpu.memory_space<vmem>>, %arg5: memref<1x1xf32, #tpu.memory_space<vmem>>) attributes {dimension_semantics = [#tpu.dimension_semantics<parallel>, #tpu.dimension_semantics<arbitrary>], iteration_bounds = array<i64: 1, 1>, scalar_prefetch = 0 : i64, scratch_operands = 1 : i64, tpu.core_type = #tpu.core_type<tc>, window_params = [{transform_indices = @transform_0, window_bounds = array<i64: 8, 128>}, {transform_indices = @transform_1, window_bounds = array<i64: 8, 128>}, {transform_indices = @transform_2, window_bounds = array<i64: 1, 8, 128>}]} {
    %c0_i32 = arith.constant 0 : i32
    %0 = arith.cmpi eq, %arg1, %c0_i32 : i32
    %1 = arith.extui %0 : i1 to i32
    %c0_i32_0 = arith.constant 0 : i32
    %2 = arith.cmpi ne, %1, %c0_i32_0 : i32
    scf.if %2 {
      %cst_17 = arith.constant 0.000000e+00 : f32
      %39 = vector.broadcast %cst_17 : f32 to vector<1x1xf32>
      %c0_18 = arith.constant 0 : index
      %c0_19 = arith.constant 0 : index
      %40 = vector.load %arg5[%c0_18, %c0_19] : memref<1x1xf32, #tpu.memory_space<vmem>>, vector<1x1xf32>
      tpu.vector_store %arg5[%c0_18, %c0_19], %39 {strides = array<i32>} : memref<1x1xf32, #tpu.memory_space<vmem>>, vector<1x1xf32>,
    } else {
    }
    %c0 = arith.constant 0 : index
    %c0_1 = arith.constant 0 : index
    %3 = vector.load %arg2[%c0, %c0_1] : memref<8x128xf32, #tpu.memory_space<vmem>>, vector<8x128xf32>
    %cst = arith.constant 2.500000e-01 : f32
    %4 = vector.broadcast %cst : f32 to vector<8x128xf32>
    %5 = arith.mulf %3, %4 : vector<8x128xf32>
    %c0_2 = arith.constant 0 : index
    %c0_3 = arith.constant 0 : index
    %6 = vector.load %arg3[%c0_2, %c0_3] : memref<8x128xf32, #tpu.memory_space<vmem>>, vector<8x128xf32>
    %cst_4 = arith.constant 2.500000e-01 : f32
    %7 = vector.broadcast %cst_4 : f32 to vector<8x128xf32>
    %8 = arith.mulf %6, %7 : vector<8x128xf32>
    %cst_5 = arith.constant dense<0xFF800000> : vector<8xf32>
    %9 = vector.multi_reduction <maximumf>, %5, %cst_5 [1] : vector<8x128xf32> to vector<8xf32>
    %10 = vector.shape_cast %9 : vector<8xf32> to vector<8x1xf32>
    %11 = vector.broadcast %10 : vector<8x1xf32> to vector<8x128xf32>
    %12 = arith.subf %5, %11 : vector<8x128xf32>
    %cst_6 = arith.constant dense<0xFF800000> : vector<8xf32>
    %13 = vector.multi_reduction <maximumf>, %8, %cst_6 [1] : vector<8x128xf32> to vector<8xf32>
    %14 = vector.shape_cast %13 : vector<8xf32> to vector<8x1xf32>
    %15 = vector.broadcast %14 : vector<8x1xf32> to vector<8x128xf32>
    %16 = arith.subf %8, %15 : vector<8x128xf32>
    %17 = math.exp %12 : vector<8x128xf32>
    %18 = math.exp %16 : vector<8x128xf32>
    %cst_7 = arith.constant dense<0.000000e+00> : vector<8xf32>
    %19 = vector.multi_reduction <add>, %17, %cst_7 [1] : vector<8x128xf32> to vector<8xf32>
    %20 = vector.shape_cast %19 : vector<8xf32> to vector<8x1xf32>
    %cst_8 = arith.constant dense<0.000000e+00> : vector<8xf32>
    %21 = vector.multi_reduction <add>, %18, %cst_8 [1] : vector<8x128xf32> to vector<8xf32>
    %22 = vector.shape_cast %21 : vector<8xf32> to vector<8x1xf32>
    %23 = arith.subf %16, %12 : vector<8x128xf32>
    %24 = arith.mulf %18, %23 : vector<8x128xf32>
    %cst_9 = arith.constant dense<0.000000e+00> : vector<8xf32>
    %25 = vector.multi_reduction <add>, %24, %cst_9 [1] : vector<8x128xf32> to vector<8xf32>
    %26 = vector.shape_cast %25 : vector<8xf32> to vector<8x1xf32>
    %27 = arith.divf %26, %22 : vector<8x1xf32>
    %28 = arith.divf %20, %22 : vector<8x1xf32>
    %29 = math.log %28 : vector<8x1xf32>
    %30 = arith.addf %27, %29 : vector<8x1xf32>
    %c0_10 = arith.constant 0 : index
    %c0_11 = arith.constant 0 : index
    %31 = vector.load %arg5[%c0_10, %c0_11] : memref<1x1xf32, #tpu.memory_space<vmem>>, vector<1x1xf32>
    %cst_12 = arith.constant dense<0.000000e+00> : vector<1xf32>
    %32 = vector.multi_reduction <add>, %30, %cst_12 [0] : vector<8x1xf32> to vector<1xf32>
    %33 = vector.shape_cast %32 : vector<1xf32> to vector<1x1xf32>
    %34 = arith.addf %31, %33 : vector<1x1xf32>
    %c0_13 = arith.constant 0 : index
    %c0_14 = arith.constant 0 : index
    %35 = vector.load %arg5[%c0_13, %c0_14] : memref<1x1xf32, #tpu.memory_space<vmem>>, vector<1x1xf32>
    tpu.vector_store %arg5[%c0_13, %c0_14], %34 {strides = array<i32>} : memref<1x1xf32, #tpu.memory_space<vmem>>, vector<1x1xf32>,
    %c0_i32_15 = arith.constant 0 : i32
    %36 = arith.cmpi eq, %arg1, %c0_i32_15 : i32
    %37 = arith.extui %36 : i1 to i32
    %c0_i32_16 = arith.constant 0 : i32
    %38 = arith.cmpi ne, %37, %c0_i32_16 : i32
    scf.if %38 {
      %c0_17 = arith.constant 0 : index
      %c0_18 = arith.constant 0 : index
      %39 = vector.load %arg5[%c0_17, %c0_18] : memref<1x1xf32, #tpu.memory_space<vmem>>, vector<1x1xf32>
      %cst_19 = arith.constant 2.000000e+00 : f32
      %40 = vector.broadcast %cst_19 : f32 to vector<1x1xf32>
      %41 = arith.mulf %39, %40 : vector<1x1xf32>
      %42 = vector.shape_cast %41 : vector<1x1xf32> to vector<1x1x1xf32>
      %43 = vector.shape_cast %42 : vector<1x1x1xf32> to vector<1x1x1xf32>
      %44 = vector.broadcast %43 : vector<1x1x1xf32> to vector<1x8x128xf32>
      %c0_20 = arith.constant 0 : index
      %c0_21 = arith.constant 0 : index
      %c0_22 = arith.constant 0 : index
      %45 = vector.load %arg4[%c0_20, %c0_21, %c0_22] : memref<1x8x128xf32, #tpu.memory_space<vmem>>, vector<1x8x128xf32>
      tpu.vector_store %arg4[%c0_20, %c0_21, %c0_22], %44 {strides = array<i32>} : memref<1x8x128xf32, #tpu.memory_space<vmem>>, vector<1x8x128xf32>,
    } else {
    }
    return
  }
  func.func @transform_0(%arg0: i32, %arg1: i32) -> (i32, i32) {
    %c1_i32 = arith.constant 1 : i32
    %0 = arith.muli %arg0, %c1_i32 : i32
    %1 = arith.addi %0, %arg1 : i32
    %c0_i32 = arith.constant 0 : i32
    %c0_i32_0 = arith.constant 0 : i32
    return %1, %c0_i32 : i32, i32
  }
  func.func @transform_1(%arg0: i32, %arg1: i32) -> (i32, i32) {
    %c1_i32 = arith.constant 1 : i32
    %0 = arith.muli %arg0, %c1_i32 : i32
    %1 = arith.addi %0, %arg1 : i32
    %c0_i32 = arith.constant 0 : i32
    %c0_i32_0 = arith.constant 0 : i32
    return %1, %c0_i32 : i32, i32
  }
  func.func @transform_2(%arg0: i32, %arg1: i32) -> (i32, i32, i32) {
    %c0_i32 = arith.constant 0 : i32
    %c0_i32_0 = arith.constant 0 : i32
    %c0_i32_1 = arith.constant 0 : i32
    return %arg0, %c0_i32, %c0_i32_0 : i32, i32, i32
  }
}

</mosaic_0001>

<bundles_post_ra>
// kernel: tpu_custom_call.1
= control target key start
LH: loop header
LB: loop body
LE: loop exit
PB: predicated region body
PF: predicated region fallthrough
CT: control target
= control target key end

     0   :  { %7 = vsyncpa [#allocation4], 0  ;;  %s264_s0 = inlined_call_operand.hbm [shape: f32[8,128], index: 0, kind: input, shape index: {}]   ;;  %s265_s1 = inlined_call_operand.hbm [shape: f32[8,128], index: 1, kind: input, shape index: {}]   ;;  %s266_s2 = inlined_call_operand.hbm [shape: f32[1,8,128], index: 2, kind: output, shape index: {}]  }
   0x1   :  { %8 = vsyncpa [#allocation7], 0 }
   0x2   :  { %9 = vsyncpa [#allocation5], 0  ;;  %s206_s9 = smov [#allocation3]   ;;  %s207_s11 = smov [#allocation6]  }
   0x3   :  { %s19_s10 = sshll.u32 %s206_s9, 4  ;;  %s32_s12 = sshll.u32 %s207_s11, 4  ;;  %s20_s10 = int_to_ptr.vmem [resolvable:$true] %s19_s10  ;;  %s33_s12 = int_to_ptr.vmem [resolvable:$true] %s32_s12 }
   0x4   :  { %s134_s15 = scalar_lea.hbm %s264_s0, 128 }
   0x5   :  { %p135_p0 = scmp.ne.s32.totalorder %s264_s0, %s134_s15  ;;  %p138_p1 = scmp.lt.u32.totalorder %s134_s15, %s264_s0 }
   0x7   :  { %p140_p2 = pnand %p138_p1, %p135_p0 }
   0x9   :  { %143 = shalt.err (!%p140_p2)
}
   0xa   :  { %s144_s20 = scalar_lea.vmem %s20_s10, 128  ;;  %p149_p4 = scmp.lt.s32.totalorder %s20_s10, %s20_s10 }
   0xb   :  { %p145_p3 = scmp.ne.s32.totalorder %s20_s10, %s144_s20  ;;  %p150_p5 = scmp.lt.s32.totalorder %s144_s20, %s144_s20 }
   0xd   :  { %p151_p6 = por %p150_p5, %p149_p4 }
   0xf   :  { %p152_p7 = pnand %p151_p6, %p145_p3 }
  0x11   :  { %155 = shalt.err (!%p152_p7)
}
  0x12   :  { %22 = dma.hbm_to_vmem [thread:$0]  %s264_s0, 128, %s20_s10, [#allocation4]  }
  0x13   :  { %s156_s25 = scalar_lea.hbm %s265_s1, 128 }
  0x14   :  { %p157_p8 = scmp.ne.s32.totalorder %s265_s1, %s156_s25  ;;  %p160_p9 = scmp.lt.u32.totalorder %s156_s25, %s265_s1 }
  0x16   :  { %p162_p10 = pnand %p160_p9, %p157_p8 }
  0x18   :  { %165 = shalt.err (!%p162_p10)
}
  0x19   :  { %s166_s30 = scalar_lea.vmem %s33_s12, 128  ;;  %p171_p12 = scmp.lt.s32.totalorder %s33_s12, %s33_s12 }
  0x1a   :  { %p167_p11 = scmp.ne.s32.totalorder %s33_s12, %s166_s30  ;;  %p172_p13 = scmp.lt.s32.totalorder %s166_s30, %s166_s30 }
  0x1c   :  { %p173_p0 = por %p172_p13, %p171_p12 }
  0x1e   :  { %p174_p1 = pnand %p173_p0, %p167_p11 }
  0x20   :  { %177 = shalt.err (!%p174_p1)
}
  0x21   :  { %35 = dma.hbm_to_vmem [thread:$0]  %s265_s1, 128, %s33_s12, [#allocation7]  }
  0x22   :  { %200 = dma.done.wait [#allocation4], 128  }
  0x23   :  { %201 = vsyncadd [#allocation4], 4294967168 }
  0x24   :  { %202 = dma.done.wait [#allocation7], 128  }
  0x25   :  { %203 = vsyncadd [#allocation7], 4294967168  ;;  %vm48_vm0 = vcmask 0   ;;  %v208_v0 = vmov 0.0   ;;  %v52_v1 = vld [vmem:[#allocation6] sm:$0xff]  ;;  %v50_v2 = vld [vmem:[#allocation3] sm:$0xff]  ;;  %v94_v33 = vlaneseq }
  0x26   :  { %49 = vst.msk [vmem:[#allocation2] sm:$0x1] %vm48_vm0, %v208_v0  ;;  %v53_v3 = vmul.f32 0.25, %v52_v1  ;;  %v51_v4 = vmul.f32 0.25, %v50_v2  ;;  %v209_v15 = vmov 0   ;;  %s210_s1 = smov [#allocation8]  }
  0x27   :  { %124 = vset.pattern.permute.xlu1 %v209_v15  ;;  %125 = vset.pattern.permute.xlu0 %v209_v15  ;;  %v95_v34 = vshrl.u32 %v94_v33, 7  ;;  %s109_s4 = sshll.u32 %s210_s1, 4  ;;  %s110_s4 = int_to_ptr.vmem [resolvable:$true] %s109_s4 }
  0x28   :  { %57 = vmax.xlane.f32.xlu0 %v53_v3  ;;  %s178_s5 = scalar_lea.vmem %s110_s4, 128  ;;  %p183_p3 = scmp.lt.s32.totalorder %s110_s4, %s110_s4 }
  0x29   :  { %v96_v35 = vsub.s32 0, %v95_v34  ;;  %p179_p2 = scmp.ne.s32.totalorder %s110_s4, %s178_s5  ;;  %p184_p4 = scmp.lt.s32.totalorder %s178_s5, %s178_s5 }
  0x2b   :  { %p185_p5 = por %p184_p4, %p183_p3 }
  0x2c   :  { %54 = vmax.xlane.f32.xlu0 %v51_v4 }
  0x2d   :  { %v78_v30 = vld [vmem:[#allocation2] sm:$0x1]  ;;  %p186_p6 = pnand %p185_p5, %p179_p2 }
  0xb5   :  { %v58_v5 = vpop.xlane.xlu0 %57 }
  0xb6   :  { %v59_v6 = vsub.f32 %v53_v3, %v58_v5 }
  0xb8   :  { %v62_v7 = vmul.f32 1.442695, %v59_v6 }
  0xb9   :  { %v55_v8 = vpop.xlane.xlu0 %54 }
  0xba   :  { %126 = vpow2.f32 %v62_v7  ;;  %v56_v9 = vsub.f32 %v51_v4, %v55_v8 }
  0xbc   :  { %v60_v10 = vmul.f32 1.442695, %v56_v9  ;;  %v68_v11 = vsub.f32 %v59_v6, %v56_v9 }
  0xbe   :  { %128 = vpow2.f32 %v60_v10 }
  0xc4   :  { %v127_v12 = vpop.eup %126 }
  0xc5   :  { %66 = vadd.xlane.f32.xlu1 %v127_v12  ;;  %v69_v13 = vmul.f32 %v127_v12, %v68_v11 }
  0xc7   :  { %70 = vadd.xlane.f32.xlu0 %v69_v13 }
  0xc8   :  { %v129_v14 = vpop.eup %128 }
  0xc9   :  { %64 = vadd.xlane.f32.xlu1 %v129_v14 }
 0x152   :  { %v67_v16 = vpop.xlane.xlu1 %66 }
 0x153   :  { %130 = vrcp.f32 %v67_v16 }
 0x154   :  { %v71_v21 = vpop.xlane.xlu0 %70 }
 0x156   :  { %v65_v17 = vpop.xlane.xlu1 %64 }
 0x15d   :  { %v131_v18 = vpop.eup %130 }
 0x15e   :  { %v74_v19 = vmul.f32 %v131_v18, %v65_v17  ;;  %v73_v22 = vmul.f32 %v131_v18, %v71_v21 }
 0x160   :  { %132 = vlog2.f32 %v74_v19 }
 0x16a   :  { %v133_v20 = vpop.eup %132 }
 0x16b   :  { %v76_v23 = vmul.f32 0.6931472, %v133_v20 }
 0x16d   :  { %v77_v24 = vadd.f32 %v76_v23, %v73_v22 }
 0x16f   :  { %v79_v25 = vrot.slane %v77_v24, 4 }
 0x171   :  { %v80_v26 = vadd.f32 %v79_v25, %v77_v24 }
 0x173   :  { %v81_v27 = vrot.slane %v80_v26, 2 }
 0x175   :  { %v82_v28 = vadd.f32 %v81_v27, %v80_v26 }
 0x177   :  { %v83_v29 = vrot.slane %v82_v28, 1 }
 0x179   :  { %v84_v31 = vadd.f32 %v83_v29, %v82_v28 }
 0x17b   :  { %v85_v32 = vadd.f32 %v84_v31, %v78_v30 }
 0x17d   :  { %87 = vst.msk [vmem:[#allocation2] sm:$0x1] %vm48_vm0, %v85_v32 }
 0x184   :  { %v91_v36 = vld [vmem:[#allocation2] sm:$0x1] }
 0x185   :  { %v92_v37 = vmul.f32 2.0, %v91_v36 }
 0x187   :  { %v97_v38 = vrot.slane %v92_v37, %v96_v35 }
 0x189   :  { %99 = vperm.xlu1 %124, %v97_v38  }
 0x208   :  { %v100_v39 = vpop.permute.xlu1 %99 }
 0x209   :  { %102 = vst [vmem:[#allocation8] sm:$0xff] %v100_v39 }
 0x20a   :  { %189 = shalt.err (!%p186_p6)
}
 0x20b   :  { %s190_s8 = scalar_lea.hbm %s266_s2, 128 }
 0x20c   :  { %p191_p7 = scmp.ne.s32.totalorder %s266_s2, %s190_s8  ;;  %p194_p8 = scmp.lt.u32.totalorder %s190_s8, %s266_s2 }
 0x20e   :  { %p196_p9 = pnand %p194_p8, %p191_p7 }
 0x210   :  { %199 = shalt.err (!%p196_p9)
}
 0x211   :  { %112 = dma.vmem_to_hbm [thread:$0]  %s110_s4, 128, %s266_s2, [#allocation5]  }
 0x212   :  { %204 = dma.done.wait [#allocation5], 128  }
 0x213   :  { %205 = vsyncadd [#allocation5], 4294967168 }
 0x214   :  { %116 = vsyncpa [#allocation4], 1 }
 0x215   :  { %117 = vsyncpa [#allocation7], 1 }
 0x216   :  { %118 = vsyncpa [#allocation5], 1 }

</bundles_post_ra>
